<compile_context>
chip_gen: v6e
topology: v6e:2x2x1
jax: 0.10.0
libtpu: 0.0.40
codegen_flags: <defaults>
</compile_context>

<pallas_src>
import jax
import jax.numpy as jnp
from jax.experimental import pallas as pl
from jax.experimental.pallas import tpu as pltpu


def attention_kernel(img_ref, hid_ref, w1_ref, b1_ref, w2_ref, b2_ref,
                     v_ref, bv_ref, wf_ref, alpha_ref):
    TB, N, E = img_ref.shape
    A = w1_ref.shape[1]

    img = img_ref[...]                                   # (TB, N, E) f32
    hid = hid_ref[...]                                   # (TB, D)    f32

    # --- projections on the MXU: bf16 operands, f32 accumulation ----------
    # Flatten (TB, N, E) -> (TB*N, E) so the MXU sees one tall matmul
    # instead of TB tiny batched ones.
    img2d = img.reshape(TB * N, E).astype(jnp.bfloat16)
    x = jnp.dot(img2d, w1_ref[...].astype(jnp.bfloat16),
                preferred_element_type=jnp.float32)      # (TB*N, A)
    x = x.reshape(TB, N, A)

    y = jnp.dot(hid.astype(jnp.bfloat16), w2_ref[...].astype(jnp.bfloat16),
                preferred_element_type=jnp.float32)      # (TB, A)
    # Both biases hoisted into the small (TB, A) term: (x + b1) + (y + b2)
    # == x + (y + b1 + b2) broadcast over regions.
    y = y + b1_ref[...] + b2_ref[...]

    # --- scoring: tanh (EUP) then V projection as VPU mul + lane reduce ----
    t = jnp.tanh(x + y[:, None, :])                      # (TB, N, A) f32
    v_row = v_ref[...]                                   # (1, A) f32
    s = jnp.sum(t * v_row[None, :, :], axis=-1) + bv_ref[0, 0]   # (TB, N)

    # --- softmax over the region axis (exact f32 normalization) ------------
    m = jnp.max(s, axis=1, keepdims=True)
    e = jnp.exp(s - m)
    denom = jnp.sum(e, axis=1, keepdims=True)
    alphas = e / denom                                   # (TB, N), sums to 1

    # --- weighted sum as VPU multiply + sublane reduce (no M=1 matvecs) ----
    weighted = jnp.sum(img * alphas[:, :, None], axis=1)  # (TB, E)

    wf_ref[...] = weighted.astype(wf_ref.dtype)
    alpha_ref[...] = alphas.astype(alpha_ref.dtype)


def attention(img_feats, hidden, params, *, tb=8):
    B, N, E = img_feats.shape
    D = hidden.shape[1]
    A = params['w1'].shape[1]

    # Batch tile: keep it a multiple of 8 (sublane) when possible, else the
    # full batch (full-dim blocks always satisfy the tiling rule).
    TB = tb if (tb <= B and B % tb == 0) else B
    grid = (B // TB,)

    in_specs = [
        pl.BlockSpec((TB, N, E), lambda b: (b, 0, 0)),                  # img tile
        pl.BlockSpec((TB, D),    lambda b: (b, 0)),                     # hidden tile
        pl.BlockSpec((E, A),     lambda b: (0, 0)),                     # w1 (resident)
        pl.BlockSpec((1, A),     lambda b: (0, 0)),                     # b1 (resident)
        pl.BlockSpec((D, A),     lambda b: (0, 0)),                     # w2 (resident)
        pl.BlockSpec((1, A),     lambda b: (0, 0)),                     # b2 (resident)
        pl.BlockSpec((1, A),     lambda b: (0, 0)),                     # v row (resident)
        pl.BlockSpec(memory_space=pltpu.MemorySpace.SMEM),              # bv scalar
    ]
    out_specs = (
        pl.BlockSpec((TB, E), lambda b: (b, 0)),                        # weighted_feats
        pl.BlockSpec((TB, N), lambda b: (b, 0)),                        # alphas
    )
    out_shape = (jax.ShapeDtypeStruct((B, E), img_feats.dtype),
                 jax.ShapeDtypeStruct((B, N), img_feats.dtype))

    return pl.pallas_call(
        attention_kernel,
        grid=grid,
        in_specs=in_specs,
        out_specs=out_specs,
        out_shape=out_shape,
        compiler_params=pltpu.CompilerParams(
            dimension_semantics=("parallel",),
            vmem_limit_bytes=32 * 1024 * 1024),
    )(img_feats, hidden, params['w1'], params['b1'], params['w2'],
      params['b2'], params['v'], params['bv'])


def init_params(key, encoder_dim, decoder_dim, attention_dim):
    """Deterministic nn.Linear-style init (uniform +-1/sqrt(fan_in))."""
    k1, k2, k3, k4, k5, k6 = jax.random.split(key, 6)

    def lin(kw, kb, fan_in, fan_out):
        bound = 1.0 / jnp.sqrt(float(fan_in))
        w = jax.random.uniform(kw, (fan_in, fan_out), jnp.float32, -bound, bound)
        b = jax.random.uniform(kb, (1, fan_out), jnp.float32, -bound, bound)
        return w, b

    w1, b1 = lin(k1, k2, encoder_dim, attention_dim)     # W1: E -> A
    w2, b2 = lin(k3, k4, decoder_dim, attention_dim)     # W2: D -> A
    v_w, v_b = lin(k5, k6, attention_dim, 1)             # V:  A -> 1
    return {'w1': w1, 'b1': b1, 'w2': w2, 'b2': b2,
            'v': v_w.reshape(1, attention_dim),          # row-vector layout
            'bv': v_b.reshape(1, 1)}


def attention_ref(img_feats, hidden, p):
    """Pure-JAX reference mirroring the PyTorch forward (f32 everywhere)."""
    x = jnp.einsum('bne,ea->bna', img_feats, p['w1']) + p['b1']
    y = hidden @ p['w2'] + p['b2']
    s = jnp.einsum('bna,a->bn', jnp.tanh(x + y[:, None, :]), p['v'][0]) + p['bv'][0, 0]
    alphas = jax.nn.softmax(s, axis=1)
    weighted = jnp.sum(img_feats * alphas[:, :, None], axis=1)
    return weighted, alphas


if __name__ == "__main__":
    B, N = 16, 8              # batch, number of image regions
    encoder_dim = 32
    decoder_dim = 16
    attention_dim = 32

    key = jax.random.PRNGKey(0)
    k_img, k_hid, k_par = jax.random.split(key, 3)

    img_feats = jax.random.normal(k_img, (B, N, encoder_dim), jnp.float32)
    hidden = jax.random.normal(k_hid, (B, decoder_dim), jnp.float32)
    params = init_params(k_par, encoder_dim, decoder_dim, attention_dim)

    weighted_feats, alphas = attention(img_feats, hidden, params, tb=8)
    jax.block_until_ready((weighted_feats, alphas))

    wf_ref, al_ref = attention_ref(img_feats, hidden, params)
    # Tolerance loosened for bf16 MXU operands.
    assert jnp.allclose(weighted_feats, wf_ref, atol=3e-2, rtol=3e-2)
    assert jnp.allclose(alphas, al_ref, atol=3e-2, rtol=3e-2)
    # Exact f32 softmax normalization -> rows sum to 1 within f32 eps.
    assert jnp.allclose(jnp.sum(alphas, axis=1), 1.0, atol=1e-3)

    print("KERNEL_OK")
</pallas_src>

<mosaic_0001>
module attributes {stable_mosaic.version = 11 : i64} {
  func.func @attention_kernel(%arg0: i32, %arg1: memref<8x8x32xf32, #tpu.memory_space<vmem>>, %arg2: memref<8x16xf32, #tpu.memory_space<vmem>>, %arg3: memref<32x32xf32, #tpu.memory_space<vmem>>, %arg4: memref<1x32xf32, #tpu.memory_space<vmem>>, %arg5: memref<16x32xf32, #tpu.memory_space<vmem>>, %arg6: memref<1x32xf32, #tpu.memory_space<vmem>>, %arg7: memref<1x32xf32, #tpu.memory_space<vmem>>, %arg8: memref<1x1xf32, #tpu.memory_space<smem>>, %arg9: memref<8x32xf32, #tpu.memory_space<vmem>>, %arg10: memref<8x8xf32, #tpu.memory_space<vmem>>) attributes {dimension_semantics = [#tpu.dimension_semantics<parallel>], iteration_bounds = array<i64: 2>, scalar_prefetch = 0 : i64, scratch_operands = 0 : i64, tpu.core_type = #tpu.core_type<tc>, window_params = [{transform_indices = @transform_0, window_bounds = array<i64: 8, 8, 32>}, {transform_indices = @transform_1, window_bounds = array<i64: 8, 16>}, {pipeline_mode = #tpu.pipeline_mode<synchronous>, transform_indices = @transform_2, window_bounds = array<i64: 32, 32>}, {pipeline_mode = #tpu.pipeline_mode<synchronous>, transform_indices = @transform_3, window_bounds = array<i64: 1, 32>}, {pipeline_mode = #tpu.pipeline_mode<synchronous>, transform_indices = @transform_4, window_bounds = array<i64: 16, 32>}, {pipeline_mode = #tpu.pipeline_mode<synchronous>, transform_indices = @transform_5, window_bounds = array<i64: 1, 32>}, {pipeline_mode = #tpu.pipeline_mode<synchronous>, transform_indices = @transform_6, window_bounds = array<i64: 1, 32>}, {transform_indices = @transform_7, window_bounds = array<i64: 1, 1>}, {transform_indices = @transform_8, window_bounds = array<i64: 8, 32>}, {transform_indices = @transform_9, window_bounds = array<i64: 8, 8>}]} {
    %c0 = arith.constant 0 : index
    %c0_0 = arith.constant 0 : index
    %c0_1 = arith.constant 0 : index
    %0 = vector.load %arg1[%c0, %c0_0, %c0_1] : memref<8x8x32xf32, #tpu.memory_space<vmem>>, vector<8x8x32xf32>
    %c0_2 = arith.constant 0 : index
    %c0_3 = arith.constant 0 : index
    %1 = vector.load %arg2[%c0_2, %c0_3] : memref<8x16xf32, #tpu.memory_space<vmem>>, vector<8x16xf32>
    %2 = vector.shape_cast %0 : vector<8x8x32xf32> to vector<64x32xf32>
    %3 = arith.truncf %2 : vector<64x32xf32> to vector<64x32xbf16>
    %c0_4 = arith.constant 0 : index
    %c0_5 = arith.constant 0 : index
    %4 = vector.load %arg3[%c0_4, %c0_5] : memref<32x32xf32, #tpu.memory_space<vmem>>, vector<32x32xf32>
    %5 = arith.truncf %4 : vector<32x32xf32> to vector<32x32xbf16>
    %cst = arith.constant dense<0.000000e+00> : vector<64x32xf32>
    %6 = tpu.matmul %3, %5, %cst {dimension_numbers = #tpu.dot_dimension_numbers<[1], [0], [0], [1], [0, 0, 1, 1], [], []>} : vector<64x32xbf16>, vector<32x32xbf16>, vector<64x32xf32> -> vector<64x32xf32>
    %7 = vector.shape_cast %6 : vector<64x32xf32> to vector<8x8x32xf32>
    %8 = arith.truncf %1 : vector<8x16xf32> to vector<8x16xbf16>
    %c0_6 = arith.constant 0 : index
    %c0_7 = arith.constant 0 : index
    %9 = vector.load %arg5[%c0_6, %c0_7] : memref<16x32xf32, #tpu.memory_space<vmem>>, vector<16x32xf32>
    %10 = arith.truncf %9 : vector<16x32xf32> to vector<16x32xbf16>
    %cst_8 = arith.constant dense<0.000000e+00> : vector<8x32xf32>
    %11 = tpu.matmul %8, %10, %cst_8 {dimension_numbers = #tpu.dot_dimension_numbers<[1], [0], [0], [1], [0, 0, 1, 1], [], []>} : vector<8x16xbf16>, vector<16x32xbf16>, vector<8x32xf32> -> vector<8x32xf32>
    %c0_9 = arith.constant 0 : index
    %c0_10 = arith.constant 0 : index
    %12 = vector.load %arg4[%c0_9, %c0_10] : memref<1x32xf32, #tpu.memory_space<vmem>>, vector<1x32xf32>
    %13 = vector.broadcast %12 : vector<1x32xf32> to vector<8x32xf32>
    %14 = arith.addf %11, %13 : vector<8x32xf32>
    %c0_11 = arith.constant 0 : index
    %c0_12 = arith.constant 0 : index
    %15 = vector.load %arg6[%c0_11, %c0_12] : memref<1x32xf32, #tpu.memory_space<vmem>>, vector<1x32xf32>
    %16 = vector.broadcast %15 : vector<1x32xf32> to vector<8x32xf32>
    %17 = arith.addf %14, %16 : vector<8x32xf32>
    %18 = vector.shape_cast %17 : vector<8x32xf32> to vector<8x1x32xf32>
    %19 = vector.broadcast %18 : vector<8x1x32xf32> to vector<8x8x32xf32>
    %20 = arith.addf %7, %19 : vector<8x8x32xf32>
    %21 = math.tanh %20 : vector<8x8x32xf32>
    %c0_13 = arith.constant 0 : index
    %c0_14 = arith.constant 0 : index
    %22 = vector.load %arg7[%c0_13, %c0_14] : memref<1x32xf32, #tpu.memory_space<vmem>>, vector<1x32xf32>
    %23 = vector.shape_cast %22 : vector<1x32xf32> to vector<1x1x32xf32>
    %24 = vector.broadcast %23 : vector<1x1x32xf32> to vector<8x8x32xf32>
    %25 = arith.mulf %21, %24 : vector<8x8x32xf32>
    %cst_15 = arith.constant dense<0.000000e+00> : vector<8x8xf32>
    %26 = vector.multi_reduction <add>, %25, %cst_15 [2] : vector<8x8x32xf32> to vector<8x8xf32>
    %c0_16 = arith.constant 0 : index
    %c0_17 = arith.constant 0 : index
    %27 = memref.load %arg8[%c0_16, %c0_17] : memref<1x1xf32, #tpu.memory_space<smem>>
    %28 = vector.broadcast %27 : f32 to vector<8x8xf32>
    %29 = arith.addf %26, %28 : vector<8x8xf32>
    %cst_18 = arith.constant dense<0xFF800000> : vector<8xf32>
    %30 = vector.multi_reduction <maximumf>, %29, %cst_18 [1] : vector<8x8xf32> to vector<8xf32>
    %31 = vector.shape_cast %30 : vector<8xf32> to vector<8x1xf32>
    %32 = vector.broadcast %31 : vector<8x1xf32> to vector<8x8xf32>
    %33 = arith.subf %29, %32 : vector<8x8xf32>
    %34 = math.exp %33 : vector<8x8xf32>
    %cst_19 = arith.constant dense<0.000000e+00> : vector<8xf32>
    %35 = vector.multi_reduction <add>, %34, %cst_19 [1] : vector<8x8xf32> to vector<8xf32>
    %36 = vector.shape_cast %35 : vector<8xf32> to vector<8x1xf32>
    %37 = vector.broadcast %36 : vector<8x1xf32> to vector<8x8xf32>
    %38 = arith.divf %34, %37 : vector<8x8xf32>
    %39 = vector.shape_cast %38 : vector<8x8xf32> to vector<8x8x1xf32>
    %40 = vector.broadcast %39 : vector<8x8x1xf32> to vector<8x8x32xf32>
    %41 = arith.mulf %0, %40 : vector<8x8x32xf32>
    %cst_20 = arith.constant dense<0.000000e+00> : vector<8x32xf32>
    %42 = vector.multi_reduction <add>, %41, %cst_20 [1] : vector<8x8x32xf32> to vector<8x32xf32>
    %c0_21 = arith.constant 0 : index
    %c0_22 = arith.constant 0 : index
    %43 = vector.load %arg9[%c0_21, %c0_22] : memref<8x32xf32, #tpu.memory_space<vmem>>, vector<8x32xf32>
    tpu.vector_store %arg9[%c0_21, %c0_22], %42 {strides = array<i32>} : memref<8x32xf32, #tpu.memory_space<vmem>>, vector<8x32xf32>,
    %c0_23 = arith.constant 0 : index
    %c0_24 = arith.constant 0 : index
    %44 = vector.load %arg10[%c0_23, %c0_24] : memref<8x8xf32, #tpu.memory_space<vmem>>, vector<8x8xf32>
    tpu.vector_store %arg10[%c0_23, %c0_24], %38 {strides = array<i32>} : memref<8x8xf32, #tpu.memory_space<vmem>>, vector<8x8xf32>,
    return
  }
  func.func @transform_0(%arg0: i32) -> (i32, i32, i32) {
    %c0_i32 = arith.constant 0 : i32
    %c0_i32_0 = arith.constant 0 : i32
    %c0_i32_1 = arith.constant 0 : i32
    return %arg0, %c0_i32, %c0_i32_0 : i32, i32, i32
  }
  func.func @transform_1(%arg0: i32) -> (i32, i32) {
    %c0_i32 = arith.constant 0 : i32
    %c0_i32_0 = arith.constant 0 : i32
    return %arg0, %c0_i32 : i32, i32
  }
  func.func @transform_2(%arg0: i32) -> (i32, i32) {
    %c0_i32 = arith.constant 0 : i32
    %c0_i32_0 = arith.constant 0 : i32
    %c0_i32_1 = arith.constant 0 : i32
    return %c0_i32, %c0_i32_0 : i32, i32
  }
  func.func @transform_3(%arg0: i32) -> (i32, i32) {
    %c0_i32 = arith.constant 0 : i32
    %c0_i32_0 = arith.constant 0 : i32
    %c0_i32_1 = arith.constant 0 : i32
    return %c0_i32, %c0_i32_0 : i32, i32
  }
  func.func @transform_4(%arg0: i32) -> (i32, i32) {
    %c0_i32 = arith.constant 0 : i32
    %c0_i32_0 = arith.constant 0 : i32
    %c0_i32_1 = arith.constant 0 : i32
    return %c0_i32, %c0_i32_0 : i32, i32
  }
  func.func @transform_5(%arg0: i32) -> (i32, i32) {
    %c0_i32 = arith.constant 0 : i32
    %c0_i32_0 = arith.constant 0 : i32
    %c0_i32_1 = arith.constant 0 : i32
    return %c0_i32, %c0_i32_0 : i32, i32
  }
  func.func @transform_6(%arg0: i32) -> (i32, i32) {
    %c0_i32 = arith.constant 0 : i32
    %c0_i32_0 = arith.constant 0 : i32
    %c0_i32_1 = arith.constant 0 : i32
    return %c0_i32, %c0_i32_0 : i32, i32
  }
  func.func @transform_7(%arg0: i32) -> (i32, i32) {
    %c0_i32 = arith.constant 0 : i32
    %c0_i32_0 = arith.constant 0 : i32
    %c0_i32_1 = arith.constant 0 : i32
    return %c0_i32, %c0_i32_0 : i32, i32
  }
  func.func @transform_8(%arg0: i32) -> (i32, i32) {
    %c0_i32 = arith.constant 0 : i32
    %c0_i32_0 = arith.constant 0 : i32
    return %arg0, %c0_i32 : i32, i32
  }
  func.func @transform_9(%arg0: i32) -> (i32, i32) {
    %c0_i32 = arith.constant 0 : i32
    %c0_i32_0 = arith.constant 0 : i32
    return %arg0, %c0_i32 : i32, i32
  }
}

</mosaic_0001>

<bundles_post_ra>
// kernel: tpu_custom_call.1
= control target key start
LH: loop header
LB: loop body
LE: loop exit
PB: predicated region body
PF: predicated region fallthrough
CT: control target
= control target key end

     0   :  { %s2218_s0 = inlined_call_operand.hbm [shape: f32[16,8,32], index: 0, kind: input, shape index: {}]   ;;  %s2219_s1 = inlined_call_operand.hbm [shape: f32[16,16], index: 1, kind: input, shape index: {}]   ;;  %s2220_s2 = inlined_call_operand.hbm [shape: f32[32,32], index: 2, kind: input, shape index: {}]   ;;  %s2221_s3 = inlined_call_operand.vmem [shape: f32[1,32], index: 3, kind: input, shape index: {}]   ;;  %s2222_s4 = inlined_call_operand.hbm [shape: f32[16,32], index: 4, kind: input, shape index: {}]   ;;  %s2223_s5 = inlined_call_operand.vmem [shape: f32[1,32], index: 5, kind: input, shape index: {}]   ;;  %s2224_s6 = inlined_call_operand.vmem [shape: f32[1,32], index: 6, kind: input, shape index: {}]   ;;  %s2225_s7 = inlined_call_operand.<no memory space> [shape: f32[1,1], index: 7, kind: input, shape index: {}]   ;;  %s2226_s8 = inlined_call_operand.hbm [shape: f32[16,32], index: 8, kind: output, shape index: {0}]   ;;  %s2227_s9 = inlined_call_operand.vmem [shape: f32[16,8], index: 9, kind: output, shape index: {1}]  }
   0x1   :  { %2237 = sst [smem:[#allocation20_spill]] %s2218_s0 }
   0x2   :  { %2238 = sst [smem:[#allocation21_spill]] %s2220_s2 }
   0x3   :  { %2239 = sst [smem:[#allocation22_spill]] %s2222_s4 }
   0x4   :  { %15 = sst [smem:[#allocation2]] %s2225_s7 }
   0x5   :  { %16 = vsyncpa [#allocation4], 0 }
   0x6   :  { %18 = vsyncpa [#allocation4 + $0x1], 0 }
   0x7   :  { %19 = vsyncpa [#allocation7], 0 }
   0x8   :  { %21 = vsyncpa [#allocation7 + $0x1], 0 }
   0x9   :  { %22 = vsyncpa [#allocation10], 0 }
   0xa   :  { %23 = vsyncpa [#allocation5], 0 }
   0xb   :  { %25 = vsyncpa [#allocation5 + $0x1], 0  ;;  %s1757_s11 = smov 0   ;;  %s1759_s12 = smov 0  }
   0xc   :  { %s1761_s13 = smov 0   ;;  %s1763_s14 = smov 0  }
   0xd LB: > { %2240 = sst [smem:[#allocation17_spill]] %s1687_s13  ;;  %s1778_s7 = sadd.s32 4294967295, %s1691_s14   ;;  %s1691_s14 = sphi %s1763_s14, %s2265_s14   ;;  %s1687_s13 = sphi %s1761_s13, %s2267_s13   ;;  %s1683_s12 = sphi %s1759_s12, %s2269_s12   ;;  %s1679_s11 = sphi %s1757_s11, %s2268_s11  }
   0xe   : > { %s1323_s15 = sadd.s32 4294967294, %s1691_s14   ;;  %p51_p0 = scmp.ne.s32.totalorder %s1683_s12, %s1679_s11 }
   0xf   : > { %p2230_p1 = scmp.eq.s32.totalorder %s1778_s7, 0  ;;  %p227_p2 = scmp.eq.s32.totalorder %s1778_s7, 1 }
  0x10   : > { %p233_p3 = scmp.eq.s32.totalorder %s1323_s15, 1  ;;  %p1324_p5 = scmp.ge.s32.totalorder %s1691_s14, 1 }
  0x11   : > { %p1787_p4 = por %p2230_p1, %p51_p0  ;;  %p266_p7 = scmp.lt.s32.totalorder %s1691_s14, 3 }
  0x12   : > { %p1792_p6 = por %p233_p3, %p51_p0  ;;  %s1693_s19 = smov [#allocation8]  }
  0x13   : > { %s2241_s16 = scalar_select %p1787_p4, 1, 0 }
  0x14   : > { %s2242_s17 = scalar_select %p1792_p6, 1, 0 }
  0x15   : > { %p1797_p8 = pnand %p1324_p5, %p266_p7  ;;  %s278_s20 = sshll.u32 %s1693_s19, 4  ;;  %s279_s20 = int_to_ptr.vmem [resolvable:$true] %s278_s20 }
  0x16   : > { %s1694_s22 = smov [#allocation9]   ;;  %s1518_s24 = scalar_lea.vmem %s279_s20, 512 }
  0x17   : > { %s2243_s18 = scalar_select %p1797_p8, 1, 0 }
  0x18   : > { %p1393_p9 = pneg %p1797_p8  ;;  %s294_s23 = sshll.u32 %s1694_s22, 4  ;;  %s295_s23 = int_to_ptr.vmem [resolvable:$true] %s294_s23 }
  0x19   : > { %p1519_p13 = scmp.ne.s32.totalorder %s279_s20, %s1518_s24  ;;  %p1526_p5 = scmp.lt.s32.totalorder %s279_s20, %s279_s20 }
  0x1a   : > { %p1806_p11 = pnand %p1393_p9, %p2230_p1  ;;  %p1527_p7 = scmp.lt.s32.totalorder %s1518_s24, %s1518_s24 }
  0x1c   : > { %p1509_p12 = pneg %p1806_p11  ;;  %p1528_p10 = por %p1527_p7, %p1526_p5 }
  0x1e   : > { %p1521_p0 = pnand %p1519_p13, %p1509_p12 }
  0x20   : > { %p1522_p3 = pneg %p1521_p0 }
  0x22   : > { %p1529_p9 = pnand %p1528_p10, %p1522_p3 }
  0x24   : > { %1532 = shalt.err (!%p1529_p9)
}
  0x25   : > { %s2228_s25 = smov 128   ;;  %s2229_s26 = smov 8  }
  0x26   : > { %s2245_s2 = sld [smem:[#allocation21_spill]]  ;;  %s1544_s29 = scalar_lea.vmem %s295_s23, 256 }
  0x27   : > { %p1545_p13 = scmp.ne.s32.totalorder %s295_s23, %s1544_s29  ;;  %p1552_p10 = scmp.lt.s32.totalorder %s295_s23, %s295_s23 }
  0x28   : > { %p1553_p3 = scmp.lt.s32.totalorder %s1544_s29, %s1544_s29 }
  0x29   : > { %p1547_p0 = pnand %p1545_p13, %p1509_p12 }
  0x2a   : > { %p1554_p7 = por %p1553_p3, %p1552_p10 }
  0x2b   : > { %p1548_p5 = pneg %p1547_p0 }
  0x2c   : > { %1396 = dma.hbm_to_vmem [thread:$0]  (!%p1806_p11), %s2245_s2, 512, %s279_s20, [#allocation7], %s2228_s25, %s2228_s25, %s2229_s26  }
  0x2d   : > { %p1555_p9 = pnand %p1554_p7, %p1548_p5 }
  0x2f   : > { %1558 = shalt.err (!%p1555_p9)
}
  0x30   : > { %s2246_s4 = sld [smem:[#allocation22_spill]]  ;;  %s1835_s15 = sadd.s32 1, %s1691_s14  }
  0x31   : > { %2247 = sst [smem:[#allocation18_spill]] %s1835_s15  ;;  %s38_s19 = sadd.s32 1, %s1687_s13 }
  0x32   : > { %s35_s20 = ssub.s32 %s1691_s14, %s1835_s15  ;;  %p45_p12 = scmp.ne.s32.totalorder %s1687_s13, %s1683_s12 }
  0x33   : > { %p36_p13 = scmp.eq.s32.totalorder %s35_s20, 0  ;;  %p46_p0 = scmp.eq.s32.totalorder %s1691_s14, 0 }
  0x34   : > { %p1845_p5 = por %p227_p2, %p45_p12  ;;  %p1413_p10 = scmp.lt.s32.totalorder %s1691_s14, 2 }
  0x35   : > { %s1851_s22 = scalar_select %p36_p13, %s1687_s13, %s38_s19  }
  0x36   : > { %1399 = dma.hbm_to_vmem [thread:$0]  (!%p1806_p11), %s2246_s4, 256, %s295_s23, [#allocation10], %s2228_s25, %s2228_s25, %s2229_s26  }
  0x37   : > { %s2248_s21 = scalar_select %p1845_p5, 1, 0 }
  0x38   : > { %2249 = sst [smem:[#allocation19_spill]] %s1851_s22  ;;  %p47_p3 = por %p46_p0, %p45_p12 }
  0x39   : > { %s1854_s24 = sand.u32 1, %s1687_s13   ;;  %s1352_s27 = sshll.u32 %s1691_s14, 10 }
  0x3a   : > { %s1328_s23 = sshll.u32 %s1854_s24, 6  ;;  %s2250_s0 = sld [smem:[#allocation20_spill]] }
  0x3b   : > { %s321_s10 = scalar_lea.vmem [#allocation3], %s1328_s23  ;;  %p1865_p2 = pnand %p1413_p10, %p47_p3 }
  0x3c   : > { %s328_s20 = sshll.u32 %s321_s10, 4  ;;  %s318_s2 = scalar_lea.sflag [#allocation4], %s1854_s24  ;;  %s1863_s20 = int_to_ptr.vmem [resolvable:$true] %s328_s20 }
  0x3d   : > { %p1561_p7 = pneg %p1865_p2 }
  0x40   : > { %s1861_s30 = scalar_lea.hbm %s2250_s0, %s1352_s27  ;;  %s1564_s28 = scalar_lea.hbm %s2250_s0, 2048 }
  0x41   : > { %s1559_s4 = scalar_lea.hbm %s1861_s30, 1024  ;;  %p1565_p13 = scmp.lt.s32.totalorder %s1861_s30, %s2250_s0 }
  0x42   : > { %p1560_p11 = scmp.ne.s32.totalorder %s1861_s30, %s1559_s4  ;;  %p1566_p0 = scmp.lt.s32.totalorder %s1564_s28, %s1559_s4 }
  0x44   : > { %p1562_p9 = pnand %p1561_p7, %p1560_p11  ;;  %p1567_p10 = por %p1566_p0, %p1565_p13 }
  0x46   : > { %p1563_p12 = pneg %p1562_p9 }
  0x48   : > { %p1568_p3 = pnand %p1567_p10, %p1563_p12 }
  0x4a   : > { %1571 = shalt.err (!%p1568_p3)
}
  0x4b   : > { %s1572_s25 = scalar_lea.vmem %s1863_s20, 1024  ;;  %s1697_s23 = smov [#allocation3]  }
  0x4c   : > { %p1573_p1 = scmp.ne.s32.totalorder %s1863_s20, %s1572_s25  ;;  %s1577_s27 = sshll.u32 %s1697_s23, 4  ;;  %s1578_s27 = int_to_ptr.vmem [resolvable:$false] %s1577_s27 }
  0x4d   : > { %s1579_s26 = scalar_lea.vmem %s1578_s27, 2048  ;;  %p1580_p6 = scmp.lt.s32.totalorder %s1863_s20, %s1578_s27 }
  0x4e   : > { %p1575_p11 = pnand %p1573_p1, %p1561_p7  ;;  %p1581_p5 = scmp.lt.s32.totalorder %s1579_s26, %s1572_s25 }
  0x50   : > { %p1576_p9 = pneg %p1575_p11  ;;  %p1582_p4 = por %p1581_p5, %p1580_p6 }
  0x52   : > { %p1583_p13 = pnand %p1582_p4, %p1576_p9 }
  0x54   : > { %1586 = shalt.err (!%p1583_p13)
}
  0x55   : > { %s2252_s4 = smov 8   ;;  %s2253_s28 = smov 128  }
  0x56   : > { %1403 = dma.hbm_to_vmem [thread:$0]  (!%p1865_p2), %s1861_s30, 1024, %s1863_s20, %s318_s2, %s2253_s28, %s2253_s28, %s2252_s4  }
  0x57   : > { %s1332_s29 = sshll.u32 %s1691_s14, 7  ;;  %s2254_s23 = sshll.u32 %s1854_s24, 3 }
  0x58   : > { %s1905_s26 = scalar_lea.hbm %s2219_s1, %s1332_s29  ;;  %s342_s27 = scalar_lea.vmem [#allocation6], %s2254_s23 }
  0x59   : > { %s349_s0 = sshll.u32 %s342_s27, 4  ;;  %s2255_s22 = sand.u32 1, %s1691_s14   ;;  %s350_s0 = int_to_ptr.vmem [resolvable:$true] %s349_s0 }
  0x5a   : > { %s339_s13 = scalar_lea.sflag [#allocation7], %s2255_s22  ;;  %s1587_s15 = scalar_lea.hbm %s1905_s26, 128 }
  0x5b   : > { %p1588_p1 = scmp.ne.s32.totalorder %s1905_s26, %s1587_s15  ;;  %s1592_s20 = scalar_lea.hbm %s2219_s1, 256 }
  0x5c   : > { %p1593_p5 = scmp.lt.s32.totalorder %s1905_s26, %s2219_s1  ;;  %p1594_p12 = scmp.lt.s32.totalorder %s1592_s20, %s1587_s15 }
  0x5d   : > { %p1590_p4 = pnand %p1588_p1, %p1561_p7 }
  0x5e   : > { %p1595_p0 = por %p1594_p12, %p1593_p5 }
  0x5f   : > { %p1591_p6 = pneg %p1590_p4 }
  0x61   : > { %p1596_p10 = pnand %p1595_p0, %p1591_p6 }
  0x63   : > { %1599 = shalt.err (!%p1596_p10)
}
  0x64   : > { %s1600_s28 = scalar_lea.vmem %s350_s0, 128  ;;  %s1698_s22 = smov [#allocation6]  }
  0x65   : > { %p1601_p3 = scmp.ne.s32.totalorder %s350_s0, %s1600_s28  ;;  %s1605_s29 = sshll.u32 %s1698_s22, 4  ;;  %s1606_s29 = int_to_ptr.vmem [resolvable:$false] %s1605_s29 }
  0x66   : > { %s1607_s10 = scalar_lea.vmem %s1606_s29, 256  ;;  %p1608_p13 = scmp.lt.s32.totalorder %s350_s0, %s1606_s29 }
  0x67   : > { %p1603_p11 = pnand %p1601_p3, %p1561_p7  ;;  %p1609_p1 = scmp.lt.s32.totalorder %s1607_s10, %s1600_s28 }
  0x69   : > { %p1604_p9 = pneg %p1603_p11  ;;  %p1610_p4 = por %p1609_p1, %p1608_p13 }
  0x6b   : > { %p1611_p8 = pnand %p1610_p4, %p1604_p9 }
  0x6d   : > { %1614 = shalt.err (!%p1611_p8)
}
  0x6e   : > { %1406 = dma.hbm_to_vmem [thread:$0]  (!%p1865_p2), %s1905_s26, 128, %s350_s0, %s339_s13  }
  0x6f   : > { %p2256_p6 = scmp.ne.s32.totalorder %s2243_s18, 0 }
  0x70   : > { %s1932_s15 = sand.u32 (!%p2256_p6), 1, %s1683_s12   ;;  %p2257_p7 = scmp.ne.s32.totalorder (!%p2256_p6), %s2241_s16, 0 }
  0x71   : > { %358 = sbr.rel (%p2256_p6) target bundleno = 1163 (0x48b), region = 52  ;;  %s1334_s25 = sshll.u32 (!%p2256_p6), %s1932_s15, 6 }
  0x72   : > { %s361_s23 = scalar_lea.sflag (!%p2256_p6), [#allocation4], %s1932_s15  ;;  %s1936_s27 = scalar_lea.vmem (!%p2256_p6), [#allocation3], %s1334_s25 }
  0x76   : > { %1658 = dma.done.wait (%p2257_p7), %s361_s23, 1024  }
  0x77   : > { %1660 = vsyncadd (%p2257_p7), %s361_s23, 4294966272  ;;  %s369_s0 = sand.u32 1, %s1778_s7   ;;  %s1335_s13 = sshll.u32 %s1932_s15, 3 }
  0x78   : > { %s370_s18 = scalar_lea.sflag [#allocation7], %s369_s0  ;;  %s373_s19 = scalar_lea.vmem [#allocation6], %s1335_s13 }
  0x79   : > { %1662 = dma.done.wait (%p2257_p7), %s370_s18, 128  }
  0x7a   : > { %1664 = vsyncadd (%p2257_p7), %s370_s18, 4294967168  ;;  %p2258_p8 = scmp.eq.s32.totalorder %s1778_s7, 0 }
  0x7c   : > { %1666 = dma.done.wait (%p2258_p8), [#allocation7], 512   ;;  %p2259_p2 = pmov %p2258_p8 }
  0x7e   : > { %1668 = vsyncadd (%p2259_p2), [#allocation7], 4294966784  ;;  %p2260_p5 = pmov %p2259_p2 }
  0x7f   : > { %p2261_p12 = pmov %p2259_p2 }
  0x80   : > { %1670 = dma.done.wait (%p2260_p5), [#allocation10], 256  }
  0x81   : > { %1672 = vsyncadd (%p2261_p12), [#allocation10], 4294967040  ;;  %v1699_v0 = vmov 0.0   ;;  %vm1700_vm0 = vmmov 0   ;;  %v446_v1 = vld [vmem:[#allocation8 + $0x10] sm:$0xff]  ;;  %v447_v2 = vld [vmem:[#allocation8 + $0x18] sm:$0xff]  ;;  %v596_v26 = vlaneseq }
  0x82   : > { %1373 = vmatprep.subr.bf16.mxu1 %v1699_v0  ;;  %1375 = vmatprep.mubr.msk.bf16.mxu1 %vm1700_vm0, %v1699_v0  ;;  %v529_v3 = vld [vmem:[#allocation9] sm:$0xff]  ;;  %v449_v4 = vpack.c.bf16 %v447_v2, %v446_v1  ;;  %v530_v5 = vld [vmem:[#allocation9 + $0x8] sm:$0xff]  ;;  %v439_v6 = vld [vmem:[%s373_s19] sm:$0xff]  ;;  %vm450_vm1 = vcmask 261120   ;;  %vm539_vm2 = vcmask 130048   ;;  %s736_s24 = sld [smem:[#allocation2]] }
  0x83   : > { %v444_v7 = vld [vmem:[#allocation8] sm:$0xff]  ;;  %v531_v8 = vpack.c.bf16 %v530_v5, %v529_v3  ;;  %v445_v9 = vld [vmem:[#allocation8 + $0x8] sm:$0xff]  ;;  %v1959_v10 = vld [vmem:[%s1936_s27] sm:$0xff]  ;;  %v528_v12 = vpack.c.bf16 %v439_v6, %v439_v6  ;;  %v1701_v24 = vmov 1966171168   ;;  %v1995_v28 = vshrl.u32 %v596_v26, 7 }
  0x84   : > { %v1962_v11 = vld [vmem:[%s1936_s27 + $0x8] sm:$0xff]  ;;  %1361 = vmatprep.subr.bf16.mxu0 %v449_v4  ;;  %v448_v13 = vpack.c.bf16 %v445_v9, %v444_v7  ;;  %v1967_v15 = vld [vmem:[%s1936_s27 + $0x10] sm:$0xff]  ;;  %v1970_v16 = vld [vmem:[%s1936_s27 + $0x18] sm:$0xff]  ;;  %v594_v25 = vunpack.c.l.s4 %v1701_v24  ;;  %vm788_vm3 = vcmask 1041409   ;;  %vm790_vm4 = vcmask 1042434   ;;  %p426_p0 = scmp.lt.s32.totalorder %s1778_s7, 1 }
  0x85   : > { %v440_v14 = vpack.c.bf16 %v1962_v11, %v1959_v10  ;;  %1374 = vmatpush3.bf16.msra.mxu1 %v531_v8  ;;  %1362 = vmatpush3.bf16.msra.mxu0 %v449_v4  ;;  %v1974_v17 = vld [vmem:[%s1936_s27 + $0x20] sm:$0xff]  ;;  %v1977_v18 = vld [vmem:[%s1936_s27 + $0x28] sm:$0xff]  ;;  %v441_v19 = vpack.c.bf16 %v1970_v16, %v1967_v15  ;;  %v1986_v21 = vld [vmem:[%s1936_s27 + $0x30] sm:$0xff]  ;;  %v2005_v40 = vsub.s32 0, %v1995_v28  ;;  %vm792_vm5 = vcmask 1043459   ;;  %s1349_s23 = sshll.u32 %s1778_s7, 7 }
  0x86   : > { %1363 = vmatprep.subr.bf16.mxu0 %v448_v13  ;;  %v442_v20 = vpack.c.bf16 %v1977_v18, %v1974_v17  ;;  %v1989_v22 = vld [vmem:[%s1936_s27 + $0x38] sm:$0xff]  ;;  %v595_v27 = vunpack.c.0.s8 %v594_v25  ;;  %v1344_v29 = vld [vmem:[%s2221_s3] ss:$0 sm:$0xff]  ;;  %vm794_vm6 = vcmask 1044484   ;;  %vm796_vm7 = vcmask 1045509   ;;  %s2143_s28 = scalar_select %p426_p0, %s1778_s7, 1 }
  0x87   : > { %1365 = vmatprep.mubr.msk.bf16.mxu0 %vm450_vm1, %v440_v14  ;;  %v443_v23 = vpack.c.bf16 %v1989_v22, %v1986_v21  ;;  %v1346_v31 = vld [vmem:[%s2223_s5] ss:$0 sm:$0xff]  ;;  %vm798_vm8 = vcmask 1046534   ;;  %vm800_vm9 = vcmask 1047559   ;;  %vm803_vm10 = vcmask 64512   ;;  %s418_s27 = scalar_lea.vmem [#allocation11], %s1335_s13  ;;  %s2179_s16 = scalar_lea.hbm %s2226_s8, %s1349_s23 }
  0x88   : > { %1376 = vmatmul.mubr.msk.bf16.vlgmr.msra.gmra.mxu1 %vm539_vm2, %v528_v12  ;;  %v598_v33 = vsub.s32 %v595_v27, %v1995_v28  ;;  %v1347_v14 = vld [vmem:[%s2224_s6] ss:$0 sm:$0xff]  ;;  %s1339_s22 = sshll.u32 %s2143_s28, 3  ;;  %s1184_s0 = sshll.u32 %s418_s27, 4  ;;  %s1185_s0 = int_to_ptr.vmem [resolvable:$true] %s1184_s0 }
  0x89   : > { %1364 = vmatpush3.bf16.msra.mxu0 %v448_v13  ;;  %s429_s25 = scalar_lea.vmem %s2227_s9, %s1339_s22  ;;  %s1167_s7 = scalar_lea.sflag [#allocation5], %s1932_s15 }
  0x8a   : > { %s1615_s13 = scalar_lea.vmem %s1185_s0, 128  ;;  %p2262_p3 = scmp.ne.s32.totalorder %s2248_s21, 0 }
  0x8b   : > { %p1616_p10 = scmp.ne.s32.totalorder %s1185_s0, %s1615_s13  ;;  %s1703_s26 = smov [#allocation11]  }
  0x8c   : > { %1366 = vmatmul.mubr.msk.bf16.vlgmr.msra.gmra.mxu0 %vm450_vm1, %v441_v19  ;;  %s1619_s2 = sshll.u32 %s1703_s26, 4  ;;  %s1620_s2 = int_to_ptr.vmem [resolvable:$false] %s1619_s2 }
  0x8d   : > { %1369 = vmatprep.mubr.msk.bf16.mxu0 %vm450_vm1, %v442_v20  ;;  %p1617_p11 = pnand %p1616_p10, %p2262_p3  ;;  %s1621_s30 = scalar_lea.vmem %s1620_s2, 256 }
  0x8e   : > { %p1622_p13 = scmp.lt.s32.totalorder %s1185_s0, %s1620_s2  ;;  %p1623_p1 = scmp.lt.s32.totalorder %s1621_s30, %s1615_s13 }
  0x8f   : > { %p1618_p9 = pneg %p1617_p11 }
  0x90   : > { %p1624_p4 = por %p1623_p1, %p1622_p13 }
  0x92   : > { %p1625_p6 = pnand %p1624_p4, %p1618_p9 }
  0x94   : > { %1370 = vmatmul.mubr.msk.bf16.gmra.mxu0 %vm450_vm1, %v443_v23 }
 0x148   : > { %v577_v30 = vpop.f32.mrf.mxu1 }
 0x149   : > { %v578_v32 = vadd.f32 %v1344_v29, %v577_v30 }
 0x14a   : > { %v1377_v34 = vpop.f32.mrf.mxu1 }
 0x14b   : > { %v590_v35 = vadd.f32 %v1346_v31, %v578_v32 }
 0x14c   : > { %v580_v36 = vpop.f32.mrf.mxu1  ;;  %v1367_v37 = vpop.f32.mrf.mxu0 }
 0x14d   : > { %v592_v38 = vcombine.high %v590_v35, %v590_v35  ;;  %v599_v39 = vrot.slane %v590_v35, %v598_v33 }
 0x14e   : > { %v1378_v41 = vpop.f32.mrf.mxu1  ;;  %v497_v42 = vpop.f32.mrf.mxu0 }
 0x14f   : > { %v606_v43 = vrot.slane %v592_v38, %v598_v33  ;;  %v607_v44 = vcombine.high %v599_v39, %v599_v39  ;;  %v615_v45 = vrot.slane %v599_v39, %v598_v33 }
 0x150   : > { %v1368_v46 = vpop.f32.mrf.mxu0 }
 0x151   : > { %v637_v47 = vcombine.high %v615_v45, %v615_v45  ;;  %v644_v48 = vrot.slane %v615_v45, %v2005_v40  ;;  %v629_v49 = vrot.slane %v607_v44, %v598_v33  ;;  %v622_v50 = vrot.slane %v606_v43, %v598_v33 }
 0x152   : > { %v500_v51 = vpop.f32.mrf.mxu0  ;;  %v608_v52 = vcombine.high %v606_v43, %v606_v43 }
 0x153   : > { %v652_v53 = vrot.slane %v637_v47, %v2005_v40  ;;  %v681_v54 = vadd.f32 %v644_v48, %v497_v42  ;;  %v639_v55 = vcombine.high %v629_v49, %v629_v49  ;;  %v648_v56 = vrot.slane %v629_v49, %v2005_v40 }
 0x154   : > { %v1371_v57 = vpop.f32.mrf.mxu0  ;;  %v638_v58 = vcombine.high %v622_v50, %v622_v50  ;;  %v660_v59 = vrot.slane %v622_v50, %v2005_v40  ;;  %v636_v60 = vrot.slane %v608_v52, %v598_v33  ;;  %v755_v48 = vand.u32 127, %v596_v26 }
 0x155   : > { %v683_v61 = vadd.f32 %v1367_v37, %v652_v53  ;;  %1459 = vtanh.f32 %v681_v54  ;;  %v656_v62 = vrot.slane %v639_v55, %v2005_v40  ;;  %v682_v63 = vadd.f32 %v648_v56, %v500_v51 }
 0x156   : > { %v668_v0 = vrot.slane %v638_v58, %v2005_v40  ;;  %v513_v1 = vpop.f32.mrf.mxu0  ;;  %v640_v2 = vcombine.high %v636_v60, %v636_v60  ;;  %v664_v8 = vrot.slane %v636_v60, %v2005_v40  ;;  %v737_v49 = vstv %s736_s24 }
 0x157   : > { %1461 = vtanh.f32 %v683_v61  ;;  %v684_v3 = vadd.f32 %v1368_v46, %v656_v62  ;;  %v685_v4 = vadd.f32 %v660_v59, %v513_v1  ;;  %v2028_v52 = vsub.s32 %v755_v48, %v1995_v28 }
 0x158   : > { %1463 = vtanh.f32 %v682_v63  ;;  %v687_v5 = vadd.f32 %v1371_v57, %v668_v0  ;;  %v1372_v6 = vpop.f32.mrf.mxu0  ;;  %v672_v7 = vrot.slane %v640_v2, %v2005_v40  ;;  %v834_v48 = vsub.s32 6, %v1995_v28 }
 0x159   : > { %1465 = vtanh.f32 %v684_v3 }
 0x15a   : > { %v516_v9 = vpop.f32.mrf.mxu0  ;;  %1467 = vtanh.f32 %v685_v4  ;;  %v688_v12 = vadd.f32 %v1372_v6, %v672_v7 }
 0x15b   : > { %v686_v13 = vadd.f32 %v664_v8, %v516_v9  ;;  %1469 = vtanh.f32 %v687_v5 }
 0x15d   : > { %1471 = vtanh.f32 %v686_v13 }
 0x15e   : > { %1473 = vtanh.f32 %v688_v12 }
 0x162   : > { %v1460_v19 = vpop.eup %1459 }
 0x163   : > { %v704_v20 = vmul.f32 %v1460_v19, %v1347_v14 }
 0x164   : > { %v1462_v23 = vpop.eup %1461 }
 0x165   : > { %v1464_v24 = vpop.eup %1463  ;;  %v712_v25 = vsel %vm450_vm1, %v704_v20, 0.0  ;;  %v706_v27 = vmul.f32 %v1462_v23, %v1347_v14 }
 0x166   : > { %v1466_v29 = vpop.eup %1465  ;;  %713 = vadd.xlane.f32.xlu0 %v712_v25  ;;  %v705_v30 = vmul.f32 %v1464_v24, %v1347_v14 }
 0x167   : > { %v718_v31 = vsel %vm450_vm1, %v706_v27, 0.0  ;;  %v707_v32 = vmul.f32 %v1466_v29, %v1347_v14  ;;  %v1468_v33 = vpop.eup %1467  ;;  %v1702_v27 = vmov 0   ;;  %v814_v29 = vsub.s32 1, %v1995_v28 }
 0x168   : > { %719 = vadd.xlane.f32.xlu1 %v718_v31  ;;  %v1470_v34 = vpop.eup %1469  ;;  %v715_v35 = vsel %vm450_vm1, %v705_v30, 0.0  ;;  %v708_v36 = vmul.f32 %v1468_v33, %v1347_v14  ;;  %1458 = vset.pattern.permute.xlu0 %v1702_v27  ;;  %v818_v30 = vsub.s32 2, %v1995_v28  ;;  %v822_v31 = vsub.s32 3, %v1995_v28 }
 0x169   : > { %v721_v38 = vsel %vm450_vm1, %v707_v32, 0.0  ;;  %v710_v44 = vmul.f32 %v1470_v34, %v1347_v14  ;;  %1457 = vset.pattern.permute.xlu1 %v1702_v27 }
 0x16a   : > { %v1472_v37 = vpop.eup %1471  ;;  %716 = vadd.xlane.f32.xlu0 %v715_v35  ;;  %v724_v42 = vsel %vm450_vm1, %v708_v36, 0.0  ;;  %v826_v36 = vsub.s32 4, %v1995_v28 }
 0x16b   : > { %v709_v39 = vmul.f32 %v1472_v37, %v1347_v14  ;;  %v1474_v41 = vpop.eup %1473  ;;  %v730_v46 = vsel %vm450_vm1, %v710_v44, 0.0  ;;  %v830_v44 = vsub.s32 5, %v1995_v28 }
 0x16c   : > { %722 = vadd.xlane.f32.xlu1 %v721_v38  ;;  %v711_v45 = vmul.f32 %v1474_v41, %v1347_v14 }
 0x16d   : > { %v727_v43 = vsel %vm450_vm1, %v709_v39, 0.0 }
 0x16e   : > { %725 = vadd.xlane.f32.xlu0 %v724_v42  ;;  %v733_v47 = vsel %vm450_vm1, %v711_v45, 0.0 }
 0x170   : > { %728 = vadd.xlane.f32.xlu1 %v727_v43 }
 0x172   : > { %731 = vadd.xlane.f32.xlu0 %v730_v46 }
 0x174   : > { %734 = vadd.xlane.f32.xlu1 %v733_v47 }
 0x1ef   : > { %v714_v50 = vpop.xlane.xlu0 %713 }
 0x1f0   : > { %v738_v53 = vadd.f32 %v737_v49, %v714_v50 }
 0x1f1   : > { %v720_v51 = vpop.xlane.xlu1 %719 }
 0x1f2   : > { %v740_v54 = vadd.f32 %v737_v49, %v720_v51  ;;  %v759_v58 = vrot.slane %v738_v53, %v2028_v52 }
 0x1f3   : > { %v717_v55 = vpop.xlane.xlu0 %716 }
 0x1f4   : > { %v739_v56 = vadd.f32 %v737_v49, %v717_v55  ;;  %v767_v26 = vrot.slane %v740_v54, %v2028_v52 }
 0x1f5   : > { %v723_v57 = vpop.xlane.xlu1 %722 }
 0x1f6   : > { %v763_v59 = vrot.slane %v739_v56, %v2028_v52  ;;  %v741_v60 = vadd.f32 %v737_v49, %v723_v57 }
 0x1f7   : > { %v726_v61 = vpop.xlane.xlu0 %725 }
 0x1f8   : > { %v789_v62 = vsel %vm788_vm3, %v763_v59, %v759_v58  ;;  %v771_v63 = vrot.slane %v741_v60, %v2028_v52  ;;  %v742_v0 = vadd.f32 %v737_v49, %v726_v61 }
 0x1f9   : > { %v791_v1 = vsel %vm790_vm4, %v767_v26, %v789_v62  ;;  %v729_v2 = vpop.xlane.xlu1 %728 }
 0x1fa   : > { %v793_v3 = vsel %vm792_vm5, %v771_v63, %v791_v1  ;;  %v775_v4 = vrot.slane %v742_v0, %v2028_v52  ;;  %v743_v5 = vadd.f32 %v737_v49, %v729_v2 }
 0x1fb   : > { %v732_v6 = vpop.xlane.xlu0 %731 }
 0x1fc   : > { %v795_v7 = vsel %vm794_vm6, %v775_v4, %v793_v3  ;;  %v779_v8 = vrot.slane %v743_v5, %v2028_v52  ;;  %v744_v9 = vadd.f32 %v737_v49, %v732_v6 }
 0x1fd   : > { %v735_v12 = vpop.xlane.xlu1 %734 }
 0x1fe   : > { %v783_v13 = vrot.slane %v744_v9, %v2028_v52  ;;  %v745_v14 = vadd.f32 %v737_v49, %v735_v12  ;;  %v797_v19 = vsel %vm796_vm7, %v779_v8, %v795_v7 }
 0x200   : > { %v787_v20 = vrot.slane %v745_v14, %v2028_v52  ;;  %v799_v23 = vsel %vm798_vm8, %v783_v13, %v797_v19 }
 0x202   : > { %v801_v24 = vsel %vm800_vm9, %v787_v20, %v799_v23 }
 0x203   : > { %v804_v25 = vsel %vm803_vm10, %v801_v24, -inf }
 0x204   : > { %805 = vmax.xlane.f32.xlu0 %v804_v25 }
 0x28d   : > { %v806_v32 = vpop.xlane.xlu0 %805 }
 0x28e   : > { %v811_v33 = vrot.slane %v806_v32, %v2005_v40  ;;  %v815_v34 = vrot.slane %v806_v32, %v814_v29  ;;  %v819_v35 = vrot.slane %v806_v32, %v818_v30  ;;  %v823_v37 = vrot.slane %v806_v32, %v822_v31 }
 0x28f   : > { %v827_v45 = vrot.slane %v806_v32, %v826_v36  ;;  %v831_v49 = vrot.slane %v806_v32, %v830_v44 }
 0x290   : > { %v848_v38 = vsub.f32 %v738_v53, %v811_v33  ;;  %v849_v39 = vsub.f32 %v739_v56, %v815_v34  ;;  %v850_v41 = vsub.f32 %v740_v54, %v819_v35  ;;  %v851_v46 = vsub.f32 %v741_v60, %v823_v37 }
 0x291   : > { %v852_v50 = vsub.f32 %v742_v0, %v827_v45  ;;  %v838_v53 = vsub.s32 7, %v1995_v28  ;;  %v835_v54 = vrot.slane %v806_v32, %v834_v48  ;;  %v853_v55 = vsub.f32 %v743_v5, %v831_v49 }
 0x292   : > { %v856_v42 = vmul.f32 1.442695, %v848_v38  ;;  %v858_v43 = vmul.f32 1.442695, %v849_v39  ;;  %v860_v47 = vmul.f32 1.442695, %v850_v41 }
 0x293   : > { %v862_v51 = vmul.f32 1.442695, %v851_v46  ;;  %v864_v56 = vmul.f32 1.442695, %v852_v50  ;;  %v839_v57 = vrot.slane %v806_v32, %v838_v53  ;;  %v854_v58 = vsub.f32 %v744_v9, %v835_v54 }
 0x294   : > { %1475 = vpow2.f32 %v856_v42  ;;  %v866_v59 = vmul.f32 1.442695, %v853_v55 }
 0x295   : > { %1477 = vpow2.f32 %v858_v43  ;;  %v855_v61 = vsub.f32 %v745_v14, %v839_v57  ;;  %v868_v62 = vmul.f32 1.442695, %v854_v58 }
 0x296   : > { %1479 = vpow2.f32 %v860_v47 }
 0x297   : > { %1481 = vpow2.f32 %v862_v51  ;;  %v870_v0 = vmul.f32 1.442695, %v855_v61 }
 0x298   : > { %1483 = vpow2.f32 %v864_v56 }
 0x299   : > { %1485 = vpow2.f32 %v866_v59 }
 0x29a   : > { %1487 = vpow2.f32 %v868_v62 }
 0x29b   : > { %1489 = vpow2.f32 %v870_v0 }
 0x2a1   : > { %v1476_v60 = vpop.eup %1475 }
 0x2a2   : > { %v2068_v26 = vpop.eup %1477  ;;  %881 = vperm.xlu1 %1457, %v1476_v60  }
 0x2a3   : > { %884 = vperm.xlu0 %1458, %v2068_v26   ;;  %v2071_v63 = vpop.eup %1479 }
 0x2a4   : > { %v2074_v1 = vpop.eup %1481 }
 0x2a5   : > { %v2077_v2 = vpop.eup %1483 }
 0x2a6   : > { %887 = vperm.xlu1 %1457, %v2071_v63   ;;  %v2080_v3 = vpop.eup %1485 }
 0x2a7   : > { %v2083_v4 = vpop.eup %1487 }
 0x2a8   : > { %v2086_v5 = vpop.eup %1489 }
 0x2aa   : > { %890 = vperm.xlu1 %1457, %v2074_v1  }
 0x2ae   : > { %893 = vperm.xlu1 %1457, %v2077_v2  }
 0x2b2   : > { %896 = vperm.xlu1 %1457, %v2080_v3  }
 0x2b6   : > { %899 = vperm.xlu1 %1457, %v2083_v4  }
 0x2ba   : > { %902 = vperm.xlu1 %1457, %v2086_v5  }
 0x31d   : > { %v882_v6 = vpop.permute.xlu1 %881 }
 0x31e   : > { %v885_v12 = vpop.permute.xlu0 %884  ;;  %v907_v19 = vrot.slane %v882_v6, %v2028_v52 }
 0x31f   : > { %v911_v14 = vrot.slane %v885_v12, %v2028_v52 }
 0x321   : > { %v888_v7 = vpop.permute.xlu1 %887  ;;  %v936_v27 = vsel %vm788_vm3, %v911_v14, %v907_v19 }
 0x322   : > { %v915_v20 = vrot.slane %v888_v7, %v2028_v52 }
 0x324   : > { %v937_v33 = vsel %vm790_vm4, %v915_v20, %v936_v27 }
 0x325   : > { %v891_v8 = vpop.permute.xlu1 %890 }
 0x326   : > { %v919_v23 = vrot.slane %v891_v8, %v2028_v52 }
 0x328   : > { %v938_v35 = vsel %vm792_vm5, %v919_v23, %v937_v33 }
 0x329   : > { %v894_v9 = vpop.permute.xlu1 %893 }
 0x32a   : > { %v923_v24 = vrot.slane %v894_v9, %v2028_v52 }
 0x32c   : > { %v939_v37 = vsel %vm794_vm6, %v923_v24, %v938_v35 }
 0x32d   : > { %v897_v13 = vpop.permute.xlu1 %896 }
 0x32e   : > { %v927_v32 = vrot.slane %v897_v13, %v2028_v52 }
 0x330   : > { %v940_v39 = vsel %vm796_vm7, %v927_v32, %v939_v37 }
 0x331   : > { %v900_v25 = vpop.permute.xlu1 %899 }
 0x332   : > { %v931_v34 = vrot.slane %v900_v25, %v2028_v52 }
 0x334   : > { %v941_v42 = vsel %vm798_vm8, %v931_v34, %v940_v39 }
 0x335   : > { %v903_v38 = vpop.permute.xlu1 %902 }
 0x336   : > { %v935_v41 = vrot.slane %v903_v38, %v2028_v52 }
 0x338   : > { %v942_v43 = vsel %vm800_vm9, %v935_v41, %v941_v42 }
 0x339   : > { %v944_v45 = vsel %vm803_vm10, %v942_v43, 0.0 }
 0x33a   : > { %945 = vadd.xlane.f32.xlu1 %v944_v45 }
 0x3c3   : > { %v946_v46 = vpop.xlane.xlu1 %945 }
 0x3c4   : > { %v951_v47 = vrot.slane %v946_v46, %v2005_v40  ;;  %v955_v49 = vrot.slane %v946_v46, %v814_v29  ;;  %v959_v50 = vrot.slane %v946_v46, %v818_v30  ;;  %v963_v51 = vrot.slane %v946_v46, %v822_v31 }
 0x3c5   : > { %v967_v54 = vrot.slane %v946_v46, %v826_v36  ;;  %v971_v40 = vrot.slane %v946_v46, %v830_v44  ;;  %v975_v30 = vrot.slane %v946_v46, %v834_v48  ;;  %v979_v36 = vrot.slane %v946_v46, %v838_v53 }
 0x3c6   : > { %1491 = vrcp.f32 %v951_v47 }
 0x3c7   : > { %1493 = vrcp.f32 %v955_v49 }
 0x3c8   : > { %1495 = vrcp.f32 %v959_v50 }
 0x3c9   : > { %1497 = vrcp.f32 %v963_v51 }
 0x3ca   : > { %1499 = vrcp.f32 %v967_v54 }
 0x3cb   : > { %1501 = vrcp.f32 %v971_v40 }
 0x3cc   : > { %1503 = vrcp.f32 %v975_v30 }
 0x3cd   : > { %1505 = vrcp.f32 %v979_v36 }
 0x3d3   : > { %v1492_v55 = vpop.eup %1491 }
 0x3d4   : > { %v989_v56 = vmul.f32 %v1492_v55, %v1476_v60  ;;  %v1494_v29 = vpop.eup %1493 }
 0x3d5   : > { %v991_v57 = vmul.f32 %v1494_v29, %v2068_v26  ;;  %v1496_v31 = vpop.eup %1495 }
 0x3d6   : > { %1006 = vperm.xlu0 %1458, %v989_v56   ;;  %v993_v58 = vmul.f32 %v1496_v31, %v2071_v63  ;;  %v1498_v59 = vpop.eup %1497 }
 0x3d7   : > { %v995_v44 = vmul.f32 %v1498_v59, %v2074_v1  ;;  %v1500_v60 = vpop.eup %1499 }
 0x3d8   : > { %v997_v48 = vmul.f32 %v1500_v60, %v2077_v2  ;;  %v1502_v61 = vpop.eup %1501 }
 0x3d9   : > { %v999_v26 = vmul.f32 %v1502_v61, %v2080_v3  ;;  %v1504_v62 = vpop.eup %1503 }
 0x3da   : > { %1011 = vperm.xlu0 %1458, %v991_v57   ;;  %v1001_v28 = vmul.f32 %v1504_v62, %v2083_v4  ;;  %v1506_v53 = vpop.eup %1505 }
 0x3db   : > { %v1003_v63 = vmul.f32 %v1506_v53, %v2086_v5 }
 0x3de   : > { %1016 = vperm.xlu0 %1458, %v993_v58  }
 0x3e2   : > { %1021 = vperm.xlu0 %1458, %v995_v44  }
 0x3e6   : > { %1026 = vperm.xlu0 %1458, %v997_v48  }
 0x3ea   : > { %1031 = vperm.xlu0 %1458, %v999_v26  }
 0x3ee   : > { %1036 = vperm.xlu0 %1458, %v1001_v28  }
 0x3f2   : > { %1041 = vperm.xlu0 %1458, %v1003_v63  }
 0x451   : > { %v1007_v0 = vpop.permute.xlu0 %1006 }
 0x452   : > { %v1044_v7 = vmul.f32 %v1007_v0, %v1959_v10  ;;  %v1128_v37 = vrot.slane %v1007_v0, %v2028_v52 }
 0x454   : > { %v1052_v9 = vsel %vm450_vm1, %v1044_v7, 0.0 }
 0x455   : > { %v1012_v6 = vpop.permute.xlu0 %1011  ;;  %v1053_v14 = vrot.slane %v1052_v9, 4 }
 0x456   : > { %v1045_v1 = vmul.f32 %v1012_v6, %v1962_v11 }
 0x457   : > { %v1054_v24 = vadd.f32 %v1053_v14, %v1052_v9 }
 0x458   : > { %v1059_v3 = vsel %vm450_vm1, %v1045_v1, 0.0 }
 0x459   : > { %v1017_v2 = vpop.permute.xlu0 %1016  ;;  %v1060_v13 = vrot.slane %v1059_v3, 4 }
 0x45a   : > { %v1046_v8 = vmul.f32 %v1017_v2, %v1967_v15  ;;  %v1136_v39 = vrot.slane %v1017_v2, %v2028_v52 }
 0x45b   : > { %v1061_v15 = vadd.f32 %v1060_v13, %v1059_v3 }
 0x45c   : > { %v1066_v4 = vsel %vm450_vm1, %v1046_v8, 0.0 }
 0x45d   : > { %v1022_v12 = vpop.permute.xlu0 %1021  ;;  %v1067_v19 = vrot.slane %v1066_v4, 4  ;;  %v1062_v38 = vrot.slane %v1061_v15, 2 }
 0x45e   : > { %v1047_v5 = vmul.f32 %v1022_v12, %v1970_v16  ;;  %v1132_v16 = vrot.slane %v1012_v6, %v2028_v52  ;;  %v1140_v43 = vrot.slane %v1022_v12, %v2028_v52 }
 0x45f   : > { %v1068_v25 = vadd.f32 %v1067_v19, %v1066_v4  ;;  %v1063_v40 = vadd.f32 %v1062_v38, %v1061_v15 }
 0x460   : > { %v1073_v11 = vsel %vm450_vm1, %v1047_v5, 0.0  ;;  %v1157_v50 = vsel %vm788_vm3, %v1132_v16, %v1128_v37 }
 0x461   : > { %v1074_v20 = vrot.slane %v1073_v11, 4  ;;  %v1027_v10 = vpop.permute.xlu0 %1026  ;;  %v1069_v42 = vrot.slane %v1068_v25, 2  ;;  %v1158_v56 = vsel %vm790_vm4, %v1136_v39, %v1157_v50  ;;  %v1064_v53 = vrot.slane %v1063_v40, 1 }
 0x462   : > { %v1048_v23 = vmul.f32 %v1027_v10, %v1974_v17  ;;  %v1055_v17 = vrot.slane %v1054_v24, 2  ;;  %v1144_v47 = vrot.slane %v1027_v10, %v2028_v52  ;;  %v1159_v36 = vsel %vm792_vm5, %v1140_v43, %v1158_v56 }
 0x463   : > { %v1075_v32 = vadd.f32 %v1074_v20, %v1073_v11  ;;  %v1070_v31 = vadd.f32 %v1069_v42, %v1068_v25 }
 0x464   : > { %v1080_v27 = vsel %vm450_vm1, %v1048_v23, 0.0  ;;  %v1056_v57 = vadd.f32 %v1055_v17, %v1054_v24  ;;  %v1160_v44 = vsel %vm794_vm6, %v1144_v47, %v1159_v36 }
 0x465   : > { %v1081_v33 = vrot.slane %v1080_v27, 4  ;;  %v1032_v34 = vpop.permute.xlu0 %1031  ;;  %v1076_v46 = vrot.slane %v1075_v32, 2  ;;  %v1071_v1 = vrot.slane %v1070_v31, 1 }
 0x466   : > { %v1049_v35 = vmul.f32 %v1032_v34, %v1977_v18  ;;  %v1148_v54 = vrot.slane %v1032_v34, %v2028_v52  ;;  %v1057_v8 = vrot.slane %v1056_v57, 1 }
 0x467   : > { %v1082_v41 = vadd.f32 %v1081_v33, %v1080_v27  ;;  %v1077_v59 = vadd.f32 %v1076_v46, %v1075_v32  ;;  %v1072_v14 = vadd.f32 %v1071_v1, %v1070_v31 }
 0x468   : > { %v1087_v45 = vsel %vm450_vm1, %v1049_v35, 0.0  ;;  %v1161_v26 = vsel %vm796_vm7, %v1148_v54, %v1160_v44  ;;  %v1058_v19 = vadd.f32 %v1057_v8, %v1056_v57 }
 0x469   : > { %v1088_v49 = vrot.slane %v1087_v45, 4  ;;  %v1037_v18 = vpop.permute.xlu0 %1036  ;;  %v1083_v51 = vrot.slane %v1082_v41, 2  ;;  %v1078_v3 = vrot.slane %v1077_v59, 1 }
 0x46a   : > { %v1050_v55 = vmul.f32 %v1037_v18, %v1986_v21  ;;  %v1152_v30 = vrot.slane %v1037_v18, %v2028_v52 }
 0x46b   : > { %v1089_v29 = vadd.f32 %v1088_v49, %v1087_v45  ;;  %v1084_v21 = vadd.f32 %v1083_v51, %v1082_v41  ;;  %v1079_v11 = vadd.f32 %v1078_v3, %v1077_v59 }
 0x46c   : > { %v1094_v58 = vsel %vm450_vm1, %v1050_v55, 0.0  ;;  %v1162_v6 = vsel %vm798_vm8, %v1152_v30, %v1161_v26 }
 0x46d   : > { %v1090_v60 = vrot.slane %v1089_v29, 2  ;;  %v1095_v48 = vrot.slane %v1094_v58, 4  ;;  %v1042_v61 = vpop.permute.xlu0 %1041  ;;  %v1085_v12 = vrot.slane %v1084_v21, 1 }
 0x46e   : > { %v1051_v62 = vmul.f32 %v1042_v61, %v1989_v22  ;;  %v1156_v28 = vrot.slane %v1042_v61, %v2028_v52  ;;  %v1065_v22 = vadd.f32 %v1064_v53, %v1063_v40 }
 0x46f   : > { %v1091_v63 = vadd.f32 %v1090_v60, %v1089_v29  ;;  %v1096_v0 = vadd.f32 %v1095_v48, %v1094_v58  ;;  %v1086_v23 = vadd.f32 %v1085_v12, %v1084_v21 }
 0x470   : > { %v1101_v7 = vsel %vm450_vm1, %v1051_v62, 0.0  ;;  %v1163_v2 = vsel %vm800_vm9, %v1156_v28, %v1162_v6  ;;  %v1116_v15 = vsel %vm788_vm3, %v1065_v22, %v1058_v19 }
 0x471   : > { %v1097_v9 = vrot.slane %v1096_v0, 2  ;;  %v1102_v4 = vrot.slane %v1101_v7, 4  ;;  %1165 = vst.msk [vmem:[%s429_s25] sm:$0xff] %vm803_vm10, %v1163_v2  ;;  %v1092_v5 = vrot.slane %v1091_v63, 1  ;;  %v1117_v27 = vsel %vm790_vm4, %v1072_v14, %v1116_v15 }
 0x472   : > { %v1118_v33 = vsel %vm792_vm5, %v1079_v11, %v1117_v27 }
 0x473   : > { %v1098_v52 = vadd.f32 %v1097_v9, %v1096_v0  ;;  %v1103_v13 = vadd.f32 %v1102_v4, %v1101_v7  ;;  %v1093_v24 = vadd.f32 %v1092_v5, %v1091_v63  ;;  %v1119_v16 = vsel %vm794_vm6, %v1086_v23, %v1118_v33 }
 0x475   : > { %v1099_v20 = vrot.slane %v1098_v52, 1  ;;  %v1104_v10 = vrot.slane %v1103_v13, 2  ;;  %v1120_v35 = vsel %vm796_vm7, %v1093_v24, %v1119_v16 }
 0x477   : > { %v1105_v25 = vadd.f32 %v1104_v10, %v1103_v13  ;;  %v1100_v32 = vadd.f32 %v1099_v20, %v1098_v52 }
 0x479   : > { %v1106_v34 = vrot.slane %v1105_v25, 1  ;;  %v1121_v38 = vsel %vm798_vm8, %v1100_v32, %v1120_v35 }
 0x47b   : > { %v1107_v37 = vadd.f32 %v1106_v34, %v1105_v25 }
 0x47d   : > { %v1122_v39 = vsel %vm800_vm9, %v1107_v37, %v1121_v38 }
 0x47e   : > { %1124 = vst.msk [vmem:[%s418_s27] sm:$0xff] %vm450_vm1, %v1122_v39 }
 0x47f   : > { %1628 = shalt.err (!%p1625_p6)
}
 0x480   : > { %s1629_s20 = scalar_lea.hbm %s2179_s16, 128  ;;  %s1633_s24 = scalar_lea.hbm %s2226_s8, 256 }
 0x481   : > { %p1630_p7 = scmp.ne.s32.totalorder %s2179_s16, %s1629_s20  ;;  %p1634_p5 = scmp.lt.s32.totalorder %s2179_s16, %s2226_s8 }
 0x482   : > { %p1635_p12 = scmp.lt.s32.totalorder %s1633_s24, %s1629_s20 }
 0x483   : > { %p1631_p8 = pnand %p1630_p7, %p2262_p3 }
 0x484   : > { %p1636_p0 = por %p1635_p12, %p1634_p5 }
 0x485   : > { %p1632_p2 = pneg %p1631_p8 }
 0x487   : > { %p1637_p10 = pnand %p1636_p0, %p1632_p2 }
 0x489   : > { %1640 = shalt.err (!%p1637_p10)
}
 0x48a   : > { %1391 = dma.vmem_to_hbm [thread:$0]  (%p2262_p3), %s1185_s0, 128, %s2179_s16, %s1167_s7  }
 0x48b PF: > { %s1199_s29 = sand.u32 1, %s1679_s11   ;;  %p2263_p11 = scmp.ne.s32.totalorder %s2242_s17, 0 }
 0x48c   : > { %p2264_p9 = scmp.ge.s32.totalorder %s1691_s14, 2  ;;  %s1200_s10 = scalar_lea.sflag [#allocation5], %s1199_s29 }
 0x48e   : > { %p1408_p13 = pnand %p2264_p9, %p2263_p11 }
 0x490   : > { %p1409_p1 = pneg %p1408_p13 }
 0x492   : > { %1674 = dma.done.wait (%p1409_p1), %s1200_s10, 128  }
 0x493   : > { %1676 = vsyncadd (%p1409_p1), %s1200_s10, 4294967168  ;;  %s2265_s14 = sld [smem:[#allocation18_spill]]  ;;  %s2268_s11 = smov %s1683_s12 }
 0x494   : > { %s2266_s25 = sld [smem:[#allocation17_spill]] }
 0x495   : > { %s2267_s13 = sld [smem:[#allocation19_spill]] }
 0x499   : > { %p28_p4 = scmp.ge.s32.totalorder %s2265_s14, 4  }
 0x49a   : > { %s2269_s12 = smov %s2266_s25 }
 0x49b   :  { %30 = sbr.rel (!%p28_p4) target bundleno = 13 (0xd), region = 130 }
 0x4a0   :  { %1212 = vsyncpa [#allocation4], 1 }
 0x4a1   :  { %1214 = vsyncpa [#allocation4 + $0x1], 1 }
 0x4a2   :  { %1215 = vsyncpa [#allocation7], 1 }
 0x4a3   :  { %1217 = vsyncpa [#allocation7 + $0x1], 1 }
 0x4a4   :  { %1218 = vsyncpa [#allocation10], 1 }
 0x4a5   :  { %1219 = vsyncpa [#allocation5], 1 }
 0x4a6   :  { %1221 = vsyncpa [#allocation5 + $0x1], 1 }

</bundles_post_ra>
